<compile_context>
chip_gen: v6e
topology: v6e:2x2x1
jax: 0.10.0
libtpu: 0.0.40
codegen_flags: <defaults>
</compile_context>

<pallas_src>
import jax
import jax.numpy as jnp
from jax.experimental import pallas as pl
from jax.experimental.pallas import tpu as pltpu


_GELU_C = 0.7978845608028654  # sqrt(2 / pi)


def _gelu_tanh(h):
    """tanh-approximate GELU; dtype-preserving (tanh maps to the EUP slot)."""
    return 0.5 * h * (1.0 + jnp.tanh(_GELU_C * (h + 0.044715 * h * h * h)))


def ffn_kernel(x_ref, w1_ref, b1_ref, w2_ref, b2_ref, o_ref):
    """One row-tile of the fused MLP: Linear1 -> GELU -> Linear2.

    x_ref  : (tm, D)  input rows (original dtype; cast to MXU dtype in-kernel)
    w1_ref : (D, H)   bf16 first Linear weight, stored (in, out)
    b1_ref : (1, H)   first Linear bias, in the activation dtype
    w2_ref : (H, D)   bf16 second Linear weight, stored (in, out)
    b2_ref : (1, D)   f32 second Linear bias
    o_ref  : (tm, D)  output rows
    """
    # In-kernel cast avoids a wrapper-side HBM cast pass over the activations.
    x = x_ref[...].astype(w1_ref.dtype)

    # Linear1 with f32 accumulation on the MXU.
    h = jnp.dot(x, w1_ref[...], preferred_element_type=jnp.float32)

    # Bias + GELU in the activation dtype (bf16 on v6e/v7x, f32 on v5e).
    act_dtype = b1_ref.dtype
    h = h.astype(act_dtype) + b1_ref[...]   # bias broadcast once per tile
    h = _gelu_tanh(h)

    # Dropout(p=0.0) is the identity in eval mode.

    # Linear2 with f32 accumulation; bias add in f32.
    y = jnp.dot(h.astype(w2_ref.dtype), w2_ref[...],
                preferred_element_type=jnp.float32)
    y = y + b2_ref[...]

    o_ref[...] = y.astype(o_ref.dtype)


def _default_act_dtype():
    """bf16 elementwise on chips with native bf16 VPU/EUP, else f32."""
    try:
        kind = jax.devices()[0].device_kind.lower()
    except Exception:
        return jnp.float32
    if any(tag in kind for tag in ("v2", "v3", "v4", "v5")):
        return jnp.float32      # no native bf16 VPU/EUP on these generations
    return jnp.bfloat16         # v6e / v7x


def feedforward_forward(x, w1, b1, w2, b2, *,
                        block_rows=256,
                        compute_dtype=jnp.bfloat16,
                        act_dtype=None,
                        out_dtype=None):
    """FeedForward forward pass.

    x  : (B, N, D)
    w1 : (D, H)  first Linear weight, already transposed to (in, out)
    b1 : (H,)    first Linear bias
    w2 : (H, D)  second Linear weight, already transposed to (in, out)
    b2 : (D,)    second Linear bias
    Returns (B, N, D) in out_dtype (defaults to x.dtype).
    """
    B, N, D = x.shape
    H = w1.shape[1]
    assert w1.shape == (D, H) and w2.shape == (H, D)
    assert b1.shape == (H,) and b2.shape == (D,)

    if act_dtype is None:
        act_dtype = _default_act_dtype()
    if out_dtype is None:
        out_dtype = x.dtype

    M = B * N
    x2 = x.reshape(M, D)                    # free view; no HBM pass

    # Row-tile size: full M for small inputs, otherwise block_rows (mult of 8).
    tm = M if M <= block_rows else block_rows
    num_tiles = pl.cdiv(M, tm)
    # No wrapper-side pad / slice: Pallas masks the partial last row tile.

    # No-ops when weights/biases were pre-cast once at init time.
    w1c = w1.astype(compute_dtype)
    w2c = w2.astype(compute_dtype)
    b1c = b1.reshape(1, H).astype(act_dtype)
    b2c = b2.reshape(1, D).astype(jnp.float32)

    itemsize = lambda dt: jnp.dtype(dt).itemsize

    # --- VMEM budget: resident (single-buffered) weights/biases, double-
    # buffered x/out tiles, plus the (tm, H) intermediate and f32 accumulators.
    weight_bytes = (D * H + H * D) * itemsize(compute_dtype) \
        + H * itemsize(act_dtype) + D * 4
    xtile_bytes = 2 * tm * D * itemsize(x.dtype)
    otile_bytes = 2 * tm * D * itemsize(out_dtype)
    interm_bytes = tm * H * (4 + itemsize(act_dtype)) + tm * D * 4
    needed = weight_bytes + xtile_bytes + otile_bytes + interm_bytes
    # Floor 32 MiB (> v5e 16 MiB default scoped limit), cap 64 MiB (v7x VMEM).
    vmem_limit = min(max(int(needed * 1.5) + (4 << 20), 32 << 20), 64 << 20)

    # Advisory cost so XLA schedules surrounding ops (residual add, LN) well.
    cost = pl.CostEstimate(
        flops=4 * M * D * H,            # two (M,D)x(D,H)-sized matmuls
        transcendentals=M * H,          # one tanh per hidden element
        bytes_accessed=(M * D * itemsize(x.dtype)
                        + M * D * itemsize(out_dtype)
                        + (D * H + H * D) * itemsize(compute_dtype)
                        + (H + D) * 4),
    )

    # Grid-invariant operands: single-buffered (constant index_map).
    invariant = pl.Buffered(buffer_count=1)

    out = pl.pallas_call(
        ffn_kernel,
        out_shape=jax.ShapeDtypeStruct((M, D), out_dtype),
        grid=(num_tiles,),
        in_specs=[
            pl.BlockSpec((tm, D), lambda i: (i, 0)),   # x rows: one tile/step
            pl.BlockSpec((D, H), lambda i: (0, 0), pipeline_mode=invariant),
            pl.BlockSpec((1, H), lambda i: (0, 0), pipeline_mode=invariant),
            pl.BlockSpec((H, D), lambda i: (0, 0), pipeline_mode=invariant),
            pl.BlockSpec((1, D), lambda i: (0, 0), pipeline_mode=invariant),
        ],
        out_specs=pl.BlockSpec((tm, D), lambda i: (i, 0)),
        compiler_params=pltpu.CompilerParams(
            dimension_semantics=("parallel",),   # megacore row sharding (v7x)
            vmem_limit_bytes=vmem_limit),
        cost_estimate=cost,
    )(x2, w1c, b1c, w2c, b2c)

    return out.reshape(B, N, D)


def feedforward_reference_f32(x, w1, b1, w2, b2):
    """Pure-JAX f32 reference (tanh-approx GELU, matching the kernel math)."""
    h = x @ w1 + b1
    h = _gelu_tanh(h)
    return h @ w2 + b2


def feedforward_reference_matched(x, w1, b1, w2, b2, *, compute_dtype, act_dtype):
    """Precision-matched reference: same casts / accumulation as the kernel."""
    h = jnp.dot(x.astype(compute_dtype), w1.astype(compute_dtype),
                preferred_element_type=jnp.float32)
    h = h.astype(act_dtype) + b1.astype(act_dtype)
    h = _gelu_tanh(h)
    y = jnp.dot(h.astype(compute_dtype), w2.astype(compute_dtype),
                preferred_element_type=jnp.float32)
    y = y + b2.astype(jnp.float32)
    return y.astype(x.dtype)


if __name__ == "__main__":
    # Small shapes consistent with the module: dim=32, hidden_dim=64.
    # (Below the 128-lane width: fine for correctness, not for perf numbers.)
    B, N, D, H = 2, 8, 32, 64

    key = jax.random.PRNGKey(0)
    kx, kw1, kb1, kw2, kb2 = jax.random.split(key, 5)

    x = jax.random.normal(kx, (B, N, D), dtype=jnp.float32)
    # nn.Linear-style init, weights stored transposed as (in, out).
    w1 = jax.random.uniform(kw1, (D, H), jnp.float32, -1.0, 1.0) / jnp.sqrt(D)
    b1 = jax.random.uniform(kb1, (H,), jnp.float32, -1.0, 1.0) / jnp.sqrt(D)
    w2 = jax.random.uniform(kw2, (H, D), jnp.float32, -1.0, 1.0) / jnp.sqrt(H)
    b2 = jax.random.uniform(kb2, (D,), jnp.float32, -1.0, 1.0) / jnp.sqrt(H)

    # Weights are cast to bf16 once here ("at init"), not per forward call.
    w1_bf16 = w1.astype(jnp.bfloat16)
    w2_bf16 = w2.astype(jnp.bfloat16)

    act_dtype = _default_act_dtype()
    y = feedforward_forward(x, w1_bf16, b1, w2_bf16, b2, act_dtype=act_dtype)
    y = jax.block_until_ready(y)
    assert y.shape == (B, N, D)

    # Precision-matched check (same casts / f32 accumulation): tight tolerance.
    y_matched = feedforward_reference_matched(
        x, w1, b1, w2, b2, compute_dtype=jnp.bfloat16, act_dtype=act_dtype)
    assert jnp.allclose(y, y_matched, atol=5e-3, rtol=5e-3), \
        "mismatch vs precision-matched reference"

    # Full-f32 reference check: tolerance budget for bf16 MXU inputs / GELU.
    y_f32 = feedforward_reference_f32(x, w1, b1, w2, b2)
    assert jnp.allclose(y, y_f32, atol=5e-2, rtol=5e-2), \
        "mismatch vs f32 reference"

    print("KERNEL_OK")
</pallas_src>

<mosaic_0001>
module attributes {stable_mosaic.version = 11 : i64} {
  func.func @ffn_kernel(%arg0: i32, %arg1: memref<16x32xf32, #tpu.memory_space<vmem>>, %arg2: memref<32x64xbf16, #tpu.memory_space<vmem>>, %arg3: memref<1x64xbf16, #tpu.memory_space<vmem>>, %arg4: memref<64x32xbf16, #tpu.memory_space<vmem>>, %arg5: memref<1x32xf32, #tpu.memory_space<vmem>>, %arg6: memref<16x32xf32, #tpu.memory_space<vmem>>) attributes {dimension_semantics = [#tpu.dimension_semantics<parallel>], iteration_bounds = array<i64: 1>, scalar_prefetch = 0 : i64, scratch_operands = 0 : i64, tpu.core_type = #tpu.core_type<tc>, window_params = [{transform_indices = @transform_0, window_bounds = array<i64: 16, 32>}, {pipeline_mode = #tpu.pipeline_mode<synchronous>, transform_indices = @transform_1, window_bounds = array<i64: 32, 64>}, {pipeline_mode = #tpu.pipeline_mode<synchronous>, transform_indices = @transform_2, window_bounds = array<i64: 1, 64>}, {pipeline_mode = #tpu.pipeline_mode<synchronous>, transform_indices = @transform_3, window_bounds = array<i64: 64, 32>}, {pipeline_mode = #tpu.pipeline_mode<synchronous>, transform_indices = @transform_4, window_bounds = array<i64: 1, 32>}, {transform_indices = @transform_5, window_bounds = array<i64: 16, 32>}]} {
    %c0 = arith.constant 0 : index
    %c0_0 = arith.constant 0 : index
    %0 = vector.load %arg1[%c0, %c0_0] : memref<16x32xf32, #tpu.memory_space<vmem>>, vector<16x32xf32>
    %1 = arith.truncf %0 : vector<16x32xf32> to vector<16x32xbf16>
    %c0_1 = arith.constant 0 : index
    %c0_2 = arith.constant 0 : index
    %2 = vector.load %arg2[%c0_1, %c0_2] : memref<32x64xbf16, #tpu.memory_space<vmem>>, vector<32x64xbf16>
    %cst = arith.constant dense<0.000000e+00> : vector<16x64xf32>
    %3 = tpu.matmul %1, %2, %cst {dimension_numbers = #tpu.dot_dimension_numbers<[1], [0], [0], [1], [0, 0, 1, 1], [], []>} : vector<16x32xbf16>, vector<32x64xbf16>, vector<16x64xf32> -> vector<16x64xf32>
    %4 = arith.truncf %3 : vector<16x64xf32> to vector<16x64xbf16>
    %c0_3 = arith.constant 0 : index
    %c0_4 = arith.constant 0 : index
    %5 = vector.load %arg3[%c0_3, %c0_4] : memref<1x64xbf16, #tpu.memory_space<vmem>>, vector<1x64xbf16>
    %6 = vector.broadcast %5 : vector<1x64xbf16> to vector<16x64xbf16>
    %7 = arith.addf %4, %6 : vector<16x64xbf16>
    %cst_5 = arith.constant 5.000000e-01 : bf16
    %8 = vector.broadcast %cst_5 : bf16 to vector<16x64xbf16>
    %9 = arith.mulf %8, %7 : vector<16x64xbf16>
    %cst_6 = arith.constant 4.467770e-02 : bf16
    %10 = vector.broadcast %cst_6 : bf16 to vector<16x64xbf16>
    %11 = arith.mulf %10, %7 : vector<16x64xbf16>
    %12 = arith.mulf %11, %7 : vector<16x64xbf16>
    %13 = arith.mulf %12, %7 : vector<16x64xbf16>
    %14 = arith.addf %7, %13 : vector<16x64xbf16>
    %cst_7 = arith.constant 7.968750e-01 : bf16
    %15 = vector.broadcast %cst_7 : bf16 to vector<16x64xbf16>
    %16 = arith.mulf %15, %14 : vector<16x64xbf16>
    %17 = math.tanh %16 : vector<16x64xbf16>
    %cst_8 = arith.constant 1.000000e+00 : bf16
    %18 = vector.broadcast %cst_8 : bf16 to vector<16x64xbf16>
    %19 = arith.addf %18, %17 : vector<16x64xbf16>
    %20 = arith.mulf %9, %19 : vector<16x64xbf16>
    %c0_9 = arith.constant 0 : index
    %c0_10 = arith.constant 0 : index
    %21 = vector.load %arg4[%c0_9, %c0_10] : memref<64x32xbf16, #tpu.memory_space<vmem>>, vector<64x32xbf16>
    %cst_11 = arith.constant dense<0.000000e+00> : vector<16x32xf32>
    %22 = tpu.matmul %20, %21, %cst_11 {dimension_numbers = #tpu.dot_dimension_numbers<[1], [0], [0], [1], [0, 0, 1, 1], [], []>} : vector<16x64xbf16>, vector<64x32xbf16>, vector<16x32xf32> -> vector<16x32xf32>
    %c0_12 = arith.constant 0 : index
    %c0_13 = arith.constant 0 : index
    %23 = vector.load %arg5[%c0_12, %c0_13] : memref<1x32xf32, #tpu.memory_space<vmem>>, vector<1x32xf32>
    %24 = vector.broadcast %23 : vector<1x32xf32> to vector<16x32xf32>
    %25 = arith.addf %22, %24 : vector<16x32xf32>
    %c0_14 = arith.constant 0 : index
    %c0_15 = arith.constant 0 : index
    %26 = vector.load %arg6[%c0_14, %c0_15] : memref<16x32xf32, #tpu.memory_space<vmem>>, vector<16x32xf32>
    tpu.vector_store %arg6[%c0_14, %c0_15], %25 {strides = array<i32>} : memref<16x32xf32, #tpu.memory_space<vmem>>, vector<16x32xf32>,
    return
  }
  func.func @transform_0(%arg0: i32) -> (i32, i32) {
    %c0_i32 = arith.constant 0 : i32
    %c0_i32_0 = arith.constant 0 : i32
    return %arg0, %c0_i32 : i32, i32
  }
  func.func @transform_1(%arg0: i32) -> (i32, i32) {
    %c0_i32 = arith.constant 0 : i32
    %c0_i32_0 = arith.constant 0 : i32
    %c0_i32_1 = arith.constant 0 : i32
    return %c0_i32, %c0_i32_0 : i32, i32
  }
  func.func @transform_2(%arg0: i32) -> (i32, i32) {
    %c0_i32 = arith.constant 0 : i32
    %c0_i32_0 = arith.constant 0 : i32
    %c0_i32_1 = arith.constant 0 : i32
    return %c0_i32, %c0_i32_0 : i32, i32
  }
  func.func @transform_3(%arg0: i32) -> (i32, i32) {
    %c0_i32 = arith.constant 0 : i32
    %c0_i32_0 = arith.constant 0 : i32
    %c0_i32_1 = arith.constant 0 : i32
    return %c0_i32, %c0_i32_0 : i32, i32
  }
  func.func @transform_4(%arg0: i32) -> (i32, i32) {
    %c0_i32 = arith.constant 0 : i32
    %c0_i32_0 = arith.constant 0 : i32
    %c0_i32_1 = arith.constant 0 : i32
    return %c0_i32, %c0_i32_0 : i32, i32
  }
  func.func @transform_5(%arg0: i32) -> (i32, i32) {
    %c0_i32 = arith.constant 0 : i32
    %c0_i32_0 = arith.constant 0 : i32
    return %arg0, %c0_i32 : i32, i32
  }
}

</mosaic_0001>

<bundles_post_ra>
// kernel: tpu_custom_call.1
= control target key start
LH: loop header
LB: loop body
LE: loop exit
PB: predicated region body
PF: predicated region fallthrough
CT: control target
= control target key end

     0   :  { %v283_v1 = vmov 0.0   ;;  %vm284_vm0 = vmmov 0   ;;  %s354_s0 = inlined_call_operand.vmem [shape: f32[16,32], index: 0, kind: input, shape index: {}]   ;;  %s355_s1 = inlined_call_operand.vmem [shape: bf16[32,64], index: 1, kind: input, shape index: {}]   ;;  %s356_s2 = inlined_call_operand.vmem [shape: bf16[1,64], index: 2, kind: input, shape index: {}]   ;;  %s357_s3 = inlined_call_operand.vmem [shape: bf16[64,32], index: 3, kind: input, shape index: {}]   ;;  %s358_s4 = inlined_call_operand.vmem [shape: f32[1,32], index: 4, kind: input, shape index: {}]   ;;  %s359_s5 = inlined_call_operand.hbm [shape: f32[16,32], index: 5, kind: output, shape index: {}]  }
   0x1   :  { %v253_v0 = vld [vmem:[%s355_s1 + $0x8] sm:$0xff]   ;;  %228 = vmatprep.subr.bf16.mxu0 %v283_v1  ;;  %v254_v2 = vld [vmem:[%s355_s1] sm:$0xff]   ;;  %236 = vmatprep.subr.bf16.mxu1 %v283_v1 }
   0x2   :  { %229 = vmatpush3.bf16.msra.mxu0 %v253_v0  ;;  %232 = vmatprep.mubr.msk.bf16.mxu0 %vm284_vm0, %v283_v1  ;;  %v26_v3 = vld [vmem:[%s354_s0] sm:$0xff]  ;;  %v27_v4 = vld [vmem:[%s354_s0 + $0x8] sm:$0xff] }
   0x3   :  { %230 = vmatprep.subr.bf16.mxu0 %v283_v1  ;;  %244 = vmatprep.mubr.msk.bf16.mxu1 %vm284_vm0, %v283_v1  ;;  %v28_v5 = vpack.c.bf16 %v27_v4, %v26_v3 }
   0x4   :  { %10 = vsyncpa [#allocation3], 0  ;;  %vm45_vm1 = vcmask 261120   ;;  %v255_v6 = vld [vmem:[%s357_s3 + $0x18] sm:$0xff]   ;;  %v256_v7 = vld [vmem:[%s357_s3 + $0x10] sm:$0xff]   ;;  %v95_v10 = vlaneseq  ;;  %vm148_vm2 = vcmask 523264  }
   0x5   :  { %237 = vmatpush3.bf16.msra.mxu1 %v255_v6  ;;  %v257_v8 = vld [vmem:[%s357_s3 + $0x8] sm:$0xff]   ;;  %v258_v9 = vld [vmem:[%s357_s3] sm:$0xff]   ;;  %s285_s9 = smov [#allocation2]  }
   0x6   :  { %231 = vmatpush3.bf16.msra.mxu0 %v254_v2  ;;  %238 = vmatprep.subr.bf16.mxu1 %v283_v1  ;;  %v96_v11 = vshrl.u32 %v95_v10, 7  ;;  %v91_v12 = vld [vmem:[%s356_s2] sm:$0x1]  ;;  %s200_s10 = sshll.u32 %s285_s9, 4  ;;  %s201_s10 = int_to_ptr.vmem [resolvable:$true] %s200_s10 }
   0x7   :  { %v93_v13 = vpack.i.b16 %v91_v12, %v91_v12  ;;  %v214_v31 = vld [vmem:[%s358_s4] ss:$0 sm:$0xff]  ;;  %s261_s11 = scalar_lea.vmem %s201_s10, 256  ;;  %p266_p1 = scmp.lt.s32.totalorder %s201_s10, %s201_s10 }
   0x8   :  { %v97_v14 = vsub.s32 0, %v96_v11  ;;  %p262_p0 = scmp.ne.s32.totalorder %s201_s10, %s261_s11  ;;  %p267_p2 = scmp.lt.s32.totalorder %s261_s11, %s261_s11 }
   0x9   :  { %233 = vmatmul.mubr.msk.bf16.vlgmr.msra.gmra.mxu0 %vm45_vm1, %v28_v5  ;;  %239 = vmatpush3.bf16.msra.mxu1 %v256_v7 }
   0xa   :  { %240 = vmatprep.subr.bf16.mxu1 %v283_v1  ;;  %v98_v17 = vrot.slane %v93_v13, %v97_v14  ;;  %p268_p3 = por %p267_p2, %p266_p1 }
   0xc   :  { %p269_p4 = pnand %p268_p3, %p262_p0 }
   0xd   :  { %241 = vmatpush3.bf16.msra.mxu1 %v257_v8 }
   0xe   :  { %242 = vmatprep.subr.bf16.mxu1 %v283_v1 }
  0x11   :  { %243 = vmatpush3.bf16.msra.mxu1 %v258_v9 }
  0xc9   :  { %v83_v15 = vpop.f32.mrf.mxu0 }
  0xcb   :  { %v234_v16 = vpop.f32.mrf.mxu0 }
  0xcd   :  { %v86_v18 = vpop.f32.mrf.mxu0 }
  0xce   :  { %v90_v19 = vpack.c.bf16 %v86_v18, %v83_v15 }
  0xcf   :  { %v235_v20 = vpop.f32.mrf.mxu0 }
  0xd0   :  { %v99_v21 = vadd.bf16 %v98_v17, %v90_v19 }
  0xd2   :  { %v101_v22 = vmul.bf16 1027030327, %v99_v21  ;;  %v100_v28 = vmul.bf16 1056980736, %v99_v21 }
  0xd4   :  { %v102_v23 = vmul.bf16 %v101_v22, %v99_v21 }
  0xd6   :  { %v103_v24 = vmul.bf16 %v102_v23, %v99_v21 }
  0xd8   :  { %v104_v25 = vadd.bf16 %v103_v24, %v99_v21 }
  0xda   :  { %v105_v26 = vmul.bf16 1061961548, %v104_v25 }
  0xdc   :  { %259 = vtanh.bf16 %v105_v26 }
  0xea   :  { %v260_v27 = vpop.eup %259 }
  0xeb   :  { %v107_v29 = vadd.bf16 1065369472, %v260_v27 }
  0xed   :  { %v108_v30 = vmul.bf16 %v107_v29, %v100_v28 }
  0xef   :  { %245 = vmatmul.mubr.msk.bf16.vlgmr.msra.gmra.mxu1 %vm148_vm2, %v108_v30 }
 0x1af   :  { %v186_v32 = vpop.f32.mrf.mxu1 }
 0x1b0   :  { %v187_v33 = vadd.f32 %v214_v31, %v186_v32 }
 0x1b1   :  { %v246_v34 = vpop.f32.mrf.mxu1 }
 0x1b2   :  { %193 = vst.msk [vmem:[#allocation2] sm:$0xff] %vm45_vm1, %v187_v33 }
 0x1b3   :  { %v189_v35 = vpop.f32.mrf.mxu1 }
 0x1b4   :  { %v190_v36 = vadd.f32 %v214_v31, %v189_v35 }
 0x1b5   :  { %v247_v37 = vpop.f32.mrf.mxu1 }
 0x1b6   :  { %194 = vst.msk [vmem:[#allocation2 + $0x8] sm:$0xff] %vm45_vm1, %v190_v36 }
 0x1b7   :  { %272 = shalt.err (!%p269_p4)
}
 0x1b8   :  { %s286_s4 = smov 128   ;;  %s287_s12 = smov 8  }
 0x1b9   :  { %206 = dma.vmem_to_hbm [thread:$0]  %s201_s10, 256, %s359_s5, [#allocation3], %s286_s4, %s286_s4, %s287_s12  }
 0x1ba   :  { %281 = dma.done.wait [#allocation3], 256  }
 0x1bb   :  { %282 = vsyncadd [#allocation3], 4294967040 }
 0x1bc   :  { %210 = vsyncpa [#allocation3], 1 }

</bundles_post_ra>
